<compile_context>
chip_gen: v7x
topology: tpu7x:2x2x1
jax: 0.10.0
libtpu: 0.0.40
codegen_flags: <defaults>
</compile_context>

<pallas_src>
import math
import functools

import jax
import jax.numpy as jnp
from jax.experimental import pallas as pl
from jax.experimental.pallas import tpu as pltpu


# ---------------------------- fused Pallas kernel ----------------------------

def _sublayer_ffn_kernel(x_ref, w1_ref, b1_ref, w2_ref, b2_ref, o_ref):
    """Fused SublayerConnection with a position-wise FFN sublayer.

    out = x + FFN(LayerNorm(x)),   FFN(z) = relu(z @ w1 + b1) @ w2 + b2
    (dropout == identity at inference; LN gamma/beta are pre-folded into
     w1/b1 by the wrapper, so the kernel only normalizes.)

    x_ref : (TM, D)   f32 row tile of the flattened (B*S, D) activation
    w1    : (D, DFF)  bf16 (gamma pre-folded),  b1 : (1, DFF) f32 (beta folded)
    w2    : (DFF, D)  bf16,                     b2 : (1, D)   f32
    o_ref : (TM, D)   f32
    """
    x = x_ref[...]

    # ---- LayerNorm prologue (f32, eps matches torch.nn.LayerNorm) ----
    mean = jnp.mean(x, axis=-1, keepdims=True)
    var = jnp.mean((x - mean) ** 2, axis=-1, keepdims=True)
    xn = (x - mean) * jax.lax.rsqrt(var + 1e-5)

    # ---- FFN sublayer on the MXU: bf16 inputs, f32 accumulation ----
    h = jnp.dot(xn.astype(jnp.bfloat16), w1_ref[...],
                preferred_element_type=jnp.float32) + b1_ref[...]
    h = jnp.maximum(h, 0.0)
    y = jnp.dot(h.astype(jnp.bfloat16), w2_ref[...],
                preferred_element_type=jnp.float32) + b2_ref[...]

    # ---- residual epilogue (dropout is identity in eval mode) ----
    # Re-read x from VMEM so the x tile is not held live across the matmuls.
    # TODO(synk): train-mode dropout would need pltpu.prng_seed/prng_random_bits
    # to build a mask in-kernel; omitted to keep eval-mode forward semantics.
    o_ref[...] = x_ref[...] + y


# ---------------------------- tile selection ----------------------------

def _pick_row_tile(M, max_rows=1024):
    """Largest row tile <= max_rows that divides M.

    Preference: full extent for small M, then multiples of 256 (v6e/v7x MXU),
    then 128 (v5e MXU), then 8 (sublane). Returns None if no divisor found
    (caller falls back to padding)."""
    if M <= max_rows:
        return M
    for t in range(max_rows - max_rows % 256, 0, -256):
        if M % t == 0:
            return t
    for t in range(max_rows - max_rows % 128, 0, -128):
        if M % t == 0:
            return t
    for t in range(max_rows - max_rows % 8, 0, -8):
        if M % t == 0:
            return t
    return None


# ---------------------------- wrapper ----------------------------

def sublayer_connection_ffn(x, ln_g, ln_b, w1, b1, w2, b2, *, max_row_tile=1024):
    """x: (B, S, D) f32. Returns x + FFN(LayerNorm(x)) as (B, S, D) f32."""
    B, S, D = x.shape
    DFF = w1.shape[1]
    M = B * S
    x2 = x.reshape(M, D)

    # Fold the LayerNorm affine into the first linear layer (done once per
    # call in f32, then cast to bf16 for the MXU):
    #   (xn*g + b) @ w1 + b1  ==  xn @ (g[:,None]*w1) + (b @ w1 + b1)
    w1f = w1.astype(jnp.float32)
    w1_folded = (ln_g.reshape(D, 1) * w1f).astype(jnp.bfloat16)
    b1_folded = (b1.reshape(1, DFF) + ln_b.reshape(1, D) @ w1f).astype(jnp.float32)
    w2_bf = w2.astype(jnp.bfloat16)
    b2_f = b2.reshape(1, D).astype(jnp.float32)

    # Row tile: prefer a divisor of M (no pad/slice HBM passes); fall back to
    # padding only when no clean divisor exists.
    tm = _pick_row_tile(M, max_row_tile)
    if tm is None:
        tm = 256
        Mp = pl.cdiv(M, tm) * tm
        x2 = jnp.pad(x2, ((0, Mp - M), (0, 0)))
    else:
        Mp = M
    n_blocks = Mp // tm

    # VMEM budget: x/out tiles double-buffered, f32 hidden, single-buffered
    # bf16 weights. Cap at 48 MiB to leave headroom on v7x (64 MiB per TC).
    est_bytes = (2 * 2 * tm * D * 4          # x + out tiles, double-buffered
                 + tm * DFF * 4              # f32 hidden activation
                 + (D * DFF + DFF * D) * 2   # bf16 weights, single-buffered
                 + (DFF + D) * 4)            # biases
    vmem_limit = int(min(48 * 1024 * 1024, max(16 * 1024 * 1024, 2 * est_bytes)))

    const = lambda i: (0, 0)            # grid-invariant operands
    single = pl.Buffered(1)             # DMA'd once -> no double buffer

    out = pl.pallas_call(
        _sublayer_ffn_kernel,
        out_shape=jax.ShapeDtypeStruct((Mp, D), jnp.float32),
        grid=(n_blocks,),
        in_specs=[
            pl.BlockSpec((tm, D), lambda i: (i, 0)),                      # x rows
            pl.BlockSpec((D, DFF), const, pipeline_mode=single),          # w1 (bf16, gamma folded)
            pl.BlockSpec((1, DFF), const, pipeline_mode=single),          # b1 (beta folded)
            pl.BlockSpec((DFF, D), const, pipeline_mode=single),          # w2 (bf16)
            pl.BlockSpec((1, D), const, pipeline_mode=single),            # b2
        ],
        out_specs=pl.BlockSpec((tm, D), lambda i: (i, 0)),
        compiler_params=pltpu.CompilerParams(
            dimension_semantics=("parallel",),   # megacore-split rows on v7x
            vmem_limit_bytes=vmem_limit,
        ),
    )(x2, w1_folded, b1_folded, w2_bf, b2_f)

    if Mp != M:
        out = out[:M]
    return out.reshape(B, S, D)


# ---------------------------- pure-JAX reference ----------------------------

def sublayer_connection_ref(x, ln_g, ln_b, w1, b1, w2, b2):
    mean = jnp.mean(x, axis=-1, keepdims=True)
    var = jnp.mean((x - mean) ** 2, axis=-1, keepdims=True)
    xn = (x - mean) * jax.lax.rsqrt(var + 1e-5)
    xn = xn * ln_g + ln_b
    h = jnp.dot(xn.astype(jnp.bfloat16), w1,
                preferred_element_type=jnp.float32) + b1
    h = jnp.maximum(h, 0.0)
    y = jnp.dot(h.astype(jnp.bfloat16), w2,
                preferred_element_type=jnp.float32) + b2
    return x + y


# ---------------------------- main ----------------------------

if __name__ == "__main__":
    B, S, D, DFF = 2, 8, 128, 512   # small, lane-aligned (D, DFF % 128 == 0)

    key = jax.random.PRNGKey(0)
    kx, kg, kb, k1, k2, k3, k4 = jax.random.split(key, 7)

    x = jax.random.normal(kx, (B, S, D), jnp.float32)
    # LayerNorm affine (perturbed from the PyTorch init to exercise the path)
    ln_g = 1.0 + 0.1 * jax.random.normal(kg, (1, D), jnp.float32)
    ln_b = 0.1 * jax.random.normal(kb, (1, D), jnp.float32)

    bound1 = 1.0 / math.sqrt(D)
    w1 = jax.random.uniform(k1, (D, DFF), jnp.float32,
                            -bound1, bound1).astype(jnp.bfloat16)
    b1 = jax.random.uniform(k2, (1, DFF), jnp.float32, -bound1, bound1)
    bound2 = 1.0 / math.sqrt(DFF)
    w2 = jax.random.uniform(k3, (DFF, D), jnp.float32,
                            -bound2, bound2).astype(jnp.bfloat16)
    b2 = jax.random.uniform(k4, (1, D), jnp.float32, -bound2, bound2)

    fwd = jax.jit(sublayer_connection_ffn)   # tm = M = 16 -> single block
    out = fwd(x, ln_g, ln_b, w1, b1, w2, b2)
    jax.block_until_ready(out)

    ref = sublayer_connection_ref(x, ln_g, ln_b, w1, b1, w2, b2)

    assert out.shape == (B, S, D)
    assert bool(jnp.all(jnp.isfinite(out)))
    assert bool(jnp.allclose(out, ref, rtol=2e-2, atol=2e-2))
    print("KERNEL_OK")
</pallas_src>

<mosaic_0001>
module attributes {stable_mosaic.version = 11 : i64} {
  func.func @_sublayer_ffn_kernel(%arg0: i32, %arg1: memref<16x128xf32, #tpu.memory_space<vmem>>, %arg2: memref<128x512xbf16, #tpu.memory_space<vmem>>, %arg3: memref<1x512xf32, #tpu.memory_space<vmem>>, %arg4: memref<512x128xbf16, #tpu.memory_space<vmem>>, %arg5: memref<1x128xf32, #tpu.memory_space<vmem>>, %arg6: memref<16x128xf32, #tpu.memory_space<vmem>>) attributes {dimension_semantics = [#tpu.dimension_semantics<parallel>], iteration_bounds = array<i64: 1>, scalar_prefetch = 0 : i64, scratch_operands = 0 : i64, tpu.core_type = #tpu.core_type<tc>, window_params = [{transform_indices = @transform_0, window_bounds = array<i64: 16, 128>}, {pipeline_mode = #tpu.pipeline_mode<synchronous>, transform_indices = @transform_1, window_bounds = array<i64: 128, 512>}, {pipeline_mode = #tpu.pipeline_mode<synchronous>, transform_indices = @transform_2, window_bounds = array<i64: 1, 512>}, {pipeline_mode = #tpu.pipeline_mode<synchronous>, transform_indices = @transform_3, window_bounds = array<i64: 512, 128>}, {pipeline_mode = #tpu.pipeline_mode<synchronous>, transform_indices = @transform_4, window_bounds = array<i64: 1, 128>}, {transform_indices = @transform_5, window_bounds = array<i64: 16, 128>}]} {
    %c0 = arith.constant 0 : index
    %c0_0 = arith.constant 0 : index
    %0 = vector.load %arg1[%c0, %c0_0] : memref<16x128xf32, #tpu.memory_space<vmem>>, vector<16x128xf32>
    %cst = arith.constant dense<0.000000e+00> : vector<16xf32>
    %1 = vector.multi_reduction <add>, %0, %cst [1] : vector<16x128xf32> to vector<16xf32>
    %2 = vector.shape_cast %1 : vector<16xf32> to vector<16x1xf32>
    %cst_1 = arith.constant 1.280000e+02 : f32
    %3 = vector.broadcast %cst_1 : f32 to vector<16x1xf32>
    %4 = arith.divf %2, %3 : vector<16x1xf32>
    %5 = vector.broadcast %4 : vector<16x1xf32> to vector<16x128xf32>
    %6 = arith.subf %0, %5 : vector<16x128xf32>
    %7 = arith.mulf %6, %6 : vector<16x128xf32>
    %cst_2 = arith.constant dense<0.000000e+00> : vector<16xf32>
    %8 = vector.multi_reduction <add>, %7, %cst_2 [1] : vector<16x128xf32> to vector<16xf32>
    %9 = vector.shape_cast %8 : vector<16xf32> to vector<16x1xf32>
    %cst_3 = arith.constant 1.280000e+02 : f32
    %10 = vector.broadcast %cst_3 : f32 to vector<16x1xf32>
    %11 = arith.divf %9, %10 : vector<16x1xf32>
    %12 = vector.broadcast %4 : vector<16x1xf32> to vector<16x128xf32>
    %13 = arith.subf %0, %12 : vector<16x128xf32>
    %cst_4 = arith.constant 9.99999974E-6 : f32
    %14 = vector.broadcast %cst_4 : f32 to vector<16x1xf32>
    %15 = arith.addf %11, %14 : vector<16x1xf32>
    %16 = math.rsqrt %15 : vector<16x1xf32>
    %17 = vector.broadcast %16 : vector<16x1xf32> to vector<16x128xf32>
    %18 = arith.mulf %13, %17 : vector<16x128xf32>
    %19 = arith.truncf %18 : vector<16x128xf32> to vector<16x128xbf16>
    %c0_5 = arith.constant 0 : index
    %c0_6 = arith.constant 0 : index
    %20 = vector.load %arg2[%c0_5, %c0_6] : memref<128x512xbf16, #tpu.memory_space<vmem>>, vector<128x512xbf16>
    %cst_7 = arith.constant dense<0.000000e+00> : vector<16x512xf32>
    %21 = tpu.matmul %19, %20, %cst_7 {dimension_numbers = #tpu.dot_dimension_numbers<[1], [0], [0], [1], [0, 0, 1, 1], [], []>} : vector<16x128xbf16>, vector<128x512xbf16>, vector<16x512xf32> -> vector<16x512xf32>
    %c0_8 = arith.constant 0 : index
    %c0_9 = arith.constant 0 : index
    %22 = vector.load %arg3[%c0_8, %c0_9] : memref<1x512xf32, #tpu.memory_space<vmem>>, vector<1x512xf32>
    %23 = vector.broadcast %22 : vector<1x512xf32> to vector<16x512xf32>
    %24 = arith.addf %21, %23 : vector<16x512xf32>
    %cst_10 = arith.constant 0.000000e+00 : f32
    %25 = vector.broadcast %cst_10 : f32 to vector<16x512xf32>
    %26 = arith.maximumf %24, %25 : vector<16x512xf32>
    %27 = arith.truncf %26 : vector<16x512xf32> to vector<16x512xbf16>
    %c0_11 = arith.constant 0 : index
    %c0_12 = arith.constant 0 : index
    %28 = vector.load %arg4[%c0_11, %c0_12] : memref<512x128xbf16, #tpu.memory_space<vmem>>, vector<512x128xbf16>
    %cst_13 = arith.constant dense<0.000000e+00> : vector<16x128xf32>
    %29 = tpu.matmul %27, %28, %cst_13 {dimension_numbers = #tpu.dot_dimension_numbers<[1], [0], [0], [1], [0, 0, 1, 1], [], []>} : vector<16x512xbf16>, vector<512x128xbf16>, vector<16x128xf32> -> vector<16x128xf32>
    %c0_14 = arith.constant 0 : index
    %c0_15 = arith.constant 0 : index
    %30 = vector.load %arg5[%c0_14, %c0_15] : memref<1x128xf32, #tpu.memory_space<vmem>>, vector<1x128xf32>
    %31 = vector.broadcast %30 : vector<1x128xf32> to vector<16x128xf32>
    %32 = arith.addf %29, %31 : vector<16x128xf32>
    %c0_16 = arith.constant 0 : index
    %c0_17 = arith.constant 0 : index
    %33 = vector.load %arg1[%c0_16, %c0_17] : memref<16x128xf32, #tpu.memory_space<vmem>>, vector<16x128xf32>
    %34 = arith.addf %33, %32 : vector<16x128xf32>
    %c0_18 = arith.constant 0 : index
    %c0_19 = arith.constant 0 : index
    %35 = vector.load %arg6[%c0_18, %c0_19] : memref<16x128xf32, #tpu.memory_space<vmem>>, vector<16x128xf32>
    tpu.vector_store %arg6[%c0_18, %c0_19], %34 {strides = array<i32>} : memref<16x128xf32, #tpu.memory_space<vmem>>, vector<16x128xf32>,
    return
  }
  func.func @transform_0(%arg0: i32) -> (i32, i32) {
    %c0_i32 = arith.constant 0 : i32
    %c0_i32_0 = arith.constant 0 : i32
    return %arg0, %c0_i32 : i32, i32
  }
  func.func @transform_1(%arg0: i32) -> (i32, i32) {
    %c0_i32 = arith.constant 0 : i32
    %c0_i32_0 = arith.constant 0 : i32
    %c0_i32_1 = arith.constant 0 : i32
    return %c0_i32, %c0_i32_0 : i32, i32
  }
  func.func @transform_2(%arg0: i32) -> (i32, i32) {
    %c0_i32 = arith.constant 0 : i32
    %c0_i32_0 = arith.constant 0 : i32
    %c0_i32_1 = arith.constant 0 : i32
    return %c0_i32, %c0_i32_0 : i32, i32
  }
  func.func @transform_3(%arg0: i32) -> (i32, i32) {
    %c0_i32 = arith.constant 0 : i32
    %c0_i32_0 = arith.constant 0 : i32
    %c0_i32_1 = arith.constant 0 : i32
    return %c0_i32, %c0_i32_0 : i32, i32
  }
  func.func @transform_4(%arg0: i32) -> (i32, i32) {
    %c0_i32 = arith.constant 0 : i32
    %c0_i32_0 = arith.constant 0 : i32
    %c0_i32_1 = arith.constant 0 : i32
    return %c0_i32, %c0_i32_0 : i32, i32
  }
  func.func @transform_5(%arg0: i32) -> (i32, i32) {
    %c0_i32 = arith.constant 0 : i32
    %c0_i32_0 = arith.constant 0 : i32
    return %arg0, %c0_i32 : i32, i32
  }
}

</mosaic_0001>

<bundles_post_ra>
// kernel: sublayer_connection_ffn.1
= control target key start
LH: loop header
LB: loop body
LE: loop exit
PB: predicated region body
PF: predicated region fallthrough
CT: control target
= control target key end

     0   :  { %s1216_s0 = inlined_call_operand.vmem [shape: f32[16,128], index: 0, kind: input, shape index: {}]   ;;  %s1217_s1 = inlined_call_operand.vmem [shape: bf16[128,512], index: 1, kind: input, shape index: {}]   ;;  %s1218_s2 = inlined_call_operand.vmem [shape: f32[1,512], index: 2, kind: input, shape index: {}]   ;;  %s1219_s3 = inlined_call_operand.vmem [shape: bf16[512,128], index: 3, kind: input, shape index: {}]   ;;  %s1220_s4 = inlined_call_operand.vmem [shape: f32[1,128], index: 4, kind: input, shape index: {}]   ;;  %s1221_s5 = inlined_call_operand.hbm [shape: f32[16,128], index: 5, kind: output, shape index: {}]  }
   0x1   :  { %v983_v0 = vld [vmem:[%s1216_s0] sm:$0xff]  ;;  %v988_v1 = vld [vmem:[%s1216_s0 + $0x8] sm:$0xff] }
   0x2   :  { %24 = vadd.xlane.f32.xlu0 %v983_v0  ;;  %v838_v2 = vld [vmem:[%s1217_s1 + $0x4] ss:$16 sps:$4 sm:$0xff]   ;;  %v840_v3 = vld [vmem:[%s1217_s1 + $0xc] ss:$16 sps:$4 sm:$0xff]   ;;  %v842_v4 = vld [vmem:[%s1217_s1] ss:$16 sps:$4 sm:$0xff]  }
   0x3   :  { %v843_v5 = vld [vmem:[%s1217_s1 + $0x8] ss:$16 sps:$4 sm:$0xff]   ;;  %v844_v6 = vld [vmem:[%s1217_s1 + $0x24] ss:$16 sps:$4 sm:$0xff]   ;;  %v846_v7 = vld [vmem:[%s1217_s1 + $0x2c] ss:$16 sps:$4 sm:$0xff]   ;;  %262 = vmatprep.subr.bf16.mxu0 %v838_v2  ;;  %305 = vmatprep.subr.bf16.mxu1 %v840_v3 }
   0x4   :  { %v848_v8 = vld [vmem:[%s1217_s1 + $0x20] ss:$16 sps:$4 sm:$0xff]   ;;  %v849_v9 = vld [vmem:[%s1217_s1 + $0x28] ss:$16 sps:$4 sm:$0xff]   ;;  %v850_v10 = vld [vmem:[%s1217_s1 + $0x44] ss:$16 sps:$4 sm:$0xff]   ;;  %263 = vmatpush1.bf16.msra.mxu0 %v842_v4  ;;  %306 = vmatpush1.bf16.msra.mxu1 %v843_v5 }
   0x5   :  { %v852_v11 = vld [vmem:[%s1217_s1 + $0x4c] ss:$16 sps:$4 sm:$0xff]   ;;  %264 = vmatprep.subr.bf16.mxu0 %v844_v6  ;;  %307 = vmatprep.subr.bf16.mxu1 %v846_v7 }
   0x6   :  { %26 = vadd.xlane.f32.xlu0 %v988_v1 }
   0x8   :  { %265 = vmatpush1.bf16.msra.mxu0 %v848_v8  ;;  %308 = vmatpush1.bf16.msra.mxu1 %v849_v9 }
   0x9   :  { %266 = vmatprep.subr.bf16.mxu0 %v850_v10  ;;  %309 = vmatprep.subr.bf16.mxu1 %v852_v11 }
   0xa   :  { %10 = vsyncpa [#allocation3], 0  ;;  %v854_v20 = vld [vmem:[%s1217_s1 + $0x40] ss:$16 sps:$4 sm:$0xff]   ;;  %v855_v21 = vld [vmem:[%s1217_s1 + $0x48] ss:$16 sps:$4 sm:$0xff]  }
   0xb   :  { %v856_v22 = vld [vmem:[%s1217_s1 + $0x64] ss:$16 sps:$4 sm:$0xff]   ;;  %v858_v23 = vld [vmem:[%s1217_s1 + $0x6c] ss:$16 sps:$4 sm:$0xff]   ;;  %v860_v24 = vld [vmem:[%s1217_s1 + $0x60] ss:$16 sps:$4 sm:$0xff]  }
   0xc   :  { %267 = vmatpush1.bf16.msra.mxu0 %v854_v20  ;;  %310 = vmatpush1.bf16.msra.mxu1 %v855_v21  ;;  %v861_v25 = vld [vmem:[%s1217_s1 + $0x68] ss:$16 sps:$4 sm:$0xff]   ;;  %v862_v26 = vld [vmem:[%s1217_s1 + $0x84] ss:$16 sps:$4 sm:$0xff]   ;;  %v864_v27 = vld [vmem:[%s1217_s1 + $0x8c] ss:$16 sps:$4 sm:$0xff]  }
   0xd   :  { %268 = vmatprep.subr.bf16.mxu0 %v856_v22  ;;  %311 = vmatprep.subr.bf16.mxu1 %v858_v23  ;;  %v866_v28 = vld [vmem:[%s1217_s1 + $0x80] ss:$16 sps:$4 sm:$0xff]   ;;  %v867_v29 = vld [vmem:[%s1217_s1 + $0x88] ss:$16 sps:$4 sm:$0xff]   ;;  %v868_v30 = vld [vmem:[%s1217_s1 + $0xa4] ss:$16 sps:$4 sm:$0xff]  }
   0xe   :  { %v870_v31 = vld [vmem:[%s1217_s1 + $0xac] ss:$16 sps:$4 sm:$0xff]   ;;  %v872_v32 = vld [vmem:[%s1217_s1 + $0xa0] ss:$16 sps:$4 sm:$0xff]   ;;  %v873_v33 = vld [vmem:[%s1217_s1 + $0xa8] ss:$16 sps:$4 sm:$0xff]  }
   0xf   :  { %v874_v34 = vld [vmem:[%s1217_s1 + $0xc4] ss:$16 sps:$4 sm:$0xff]   ;;  %v876_v35 = vld [vmem:[%s1217_s1 + $0xcc] ss:$16 sps:$4 sm:$0xff]   ;;  %v878_v36 = vld [vmem:[%s1217_s1 + $0xc0] ss:$16 sps:$4 sm:$0xff]  }
  0x10   :  { %269 = vmatpush1.bf16.msra.mxu0 %v860_v24  ;;  %312 = vmatpush1.bf16.msra.mxu1 %v861_v25  ;;  %v879_v37 = vld [vmem:[%s1217_s1 + $0xc8] ss:$16 sps:$4 sm:$0xff]   ;;  %v880_v38 = vld [vmem:[%s1217_s1 + $0xe4] ss:$16 sps:$4 sm:$0xff]   ;;  %v882_v39 = vld [vmem:[%s1217_s1 + $0xec] ss:$16 sps:$4 sm:$0xff]   ;;  %v82_v24 = vlaneseq }
  0x11   :  { %270 = vmatprep.subr.bf16.mxu0 %v862_v26  ;;  %313 = vmatprep.subr.bf16.mxu1 %v864_v27  ;;  %v946_v40 = vmov 0   ;;  %v884_v41 = vld [vmem:[%s1217_s1 + $0xe0] ss:$16 sps:$4 sm:$0xff]   ;;  %v885_v42 = vld [vmem:[%s1217_s1 + $0xe8] ss:$16 sps:$4 sm:$0xff]   ;;  %s947_s19 = smov [#allocation2]  }
  0x12   :  { %294 = vmatprep.mubr.bf16.mxu0 %v946_v40  ;;  %337 = vmatprep.mubr.bf16.mxu1 %v946_v40  ;;  %v886_v43 = vld [vmem:[%s1219_s3 + $0x40] sm:$0xff]   ;;  %v890_v58 = vld [vmem:[%s1219_s3 + $0x48] sm:$0xff]   ;;  %v894_v62 = vld [vmem:[%s1219_s3 + $0x50] sm:$0xff]   ;;  %v83_v25 = vshrl.u32 %v82_v24, 7  ;;  %s714_s20 = sshll.u32 %s947_s19, 4  ;;  %s715_s20 = int_to_ptr.vmem [resolvable:$true] %s714_s20 }
  0x13   :  { %v887_v44 = vld [vmem:[%s1219_s3 + $0xc0] sm:$0xff]   ;;  %v891_v59 = vld [vmem:[%s1219_s3 + $0xc8] sm:$0xff]   ;;  %v895_v63 = vld [vmem:[%s1219_s3 + $0xd0] sm:$0xff]   ;;  %p927_p1 = scmp.lt.s32.totalorder %s715_s20, %s715_s20 }
  0x14   :  { %271 = vmatpush1.bf16.msra.mxu0 %v866_v28  ;;  %314 = vmatpush1.bf16.msra.mxu1 %v867_v29  ;;  %v888_v55 = vld [vmem:[%s1219_s3] sm:$0xff]   ;;  %v892_v60 = vld [vmem:[%s1219_s3 + $0x8] sm:$0xff]   ;;  %v896_v2 = vld [vmem:[%s1219_s3 + $0x10] sm:$0xff]   ;;  %v84_v26 = vsub.s32 0, %v83_v25  ;;  %v92_v27 = vsub.s32 2, %v83_v25  ;;  %v88_v29 = vsub.s32 1, %v83_v25 }
  0x15   :  { %272 = vmatprep.subr.bf16.mxu0 %v868_v30  ;;  %315 = vmatprep.subr.bf16.mxu1 %v870_v31  ;;  %v889_v56 = vld [vmem:[%s1219_s3 + $0x80] sm:$0xff]   ;;  %v893_v61 = vld [vmem:[%s1219_s3 + $0x88] sm:$0xff]   ;;  %v897_v3 = vld [vmem:[%s1219_s3 + $0x90] sm:$0xff]   ;;  %v96_v30 = vsub.s32 3, %v83_v25 }
  0x16   :  { %v898_v4 = vld [vmem:[%s1219_s3 + $0x58] sm:$0xff]   ;;  %v902_v8 = vld [vmem:[%s1219_s3 + $0x60] sm:$0xff]  }
  0x17   :  { %v899_v5 = vld [vmem:[%s1219_s3 + $0xd8] sm:$0xff]   ;;  %v903_v9 = vld [vmem:[%s1219_s3 + $0xe0] sm:$0xff]  }
  0x18   :  { %273 = vmatpush1.bf16.msra.mxu0 %v872_v32  ;;  %316 = vmatpush1.bf16.msra.mxu1 %v873_v33  ;;  %v900_v6 = vld [vmem:[%s1219_s3 + $0x18] sm:$0xff]   ;;  %v904_v10 = vld [vmem:[%s1219_s3 + $0x20] sm:$0xff]  }
  0x19   :  { %274 = vmatprep.subr.bf16.mxu0 %v874_v34  ;;  %317 = vmatprep.subr.bf16.mxu1 %v876_v35  ;;  %v901_v7 = vld [vmem:[%s1219_s3 + $0x98] sm:$0xff]   ;;  %v905_v11 = vld [vmem:[%s1219_s3 + $0xa0] sm:$0xff]  }
  0x1a   :  { %v914_v20 = vld [vmem:[%s1219_s3 + $0x78] sm:$0xff]   ;;  %v80_v28 = vld [vmem:[%s1218_s2] sm:$0xf] }
  0x1b   :  { %v915_v21 = vld [vmem:[%s1219_s3 + $0xf8] sm:$0xff]   ;;  %v85_v31 = vrot.slane %v80_v28, %v84_v26  ;;  %v93_v32 = vrot.slane %v80_v28, %v92_v27  ;;  %v89_v33 = vrot.slane %v80_v28, %v88_v29  ;;  %v97_v34 = vrot.slane %v80_v28, %v96_v30 }
  0x1c   :  { %275 = vmatpush1.bf16.msra.mxu0 %v878_v36  ;;  %318 = vmatpush1.bf16.msra.mxu1 %v879_v37  ;;  %v916_v22 = vld [vmem:[%s1219_s3 + $0x38] sm:$0xff]  }
  0x1d   :  { %276 = vmatprep.subr.bf16.mxu0 %v880_v38  ;;  %319 = vmatprep.subr.bf16.mxu1 %v882_v39  ;;  %v917_v23 = vld [vmem:[%s1219_s3 + $0xb8] sm:$0xff]  }
  0x20   :  { %277 = vmatpush1.bf16.msra.mxu0 %v884_v41  ;;  %320 = vmatpush1.bf16.msra.mxu1 %v885_v42 }
  0x21   :  { %790 = vmatprep.subr.bf16.mxu0 %v886_v43  ;;  %812 = vmatprep.subr.bf16.mxu1 %v887_v44 }
  0x8f   :  { %v25_v12 = vpop.xlane.xlu0 %24 }
  0x90   :  { %v29_v13 = vmul.f32 0.0078125, %v25_v12  ;;  %v906_v12 = vld [vmem:[%s1219_s3 + $0x68] sm:$0xff]  }
  0x92   :  { %v1023_v14 = vsub.f32 %v983_v0, %v29_v13  ;;  %v907_v13 = vld [vmem:[%s1219_s3 + $0xe8] sm:$0xff]  }
  0x93   :  { %v27_v15 = vpop.xlane.xlu0 %26 }
  0x94   :  { %v30_v16 = vmul.f32 0.0078125, %v27_v15  ;;  %v33_v17 = vmul.f32 %v1023_v14, %v1023_v14  ;;  %v909_v15 = vld [vmem:[%s1219_s3 + $0xa8] sm:$0xff]  }
  0x96   :  { %v1028_v18 = vsub.f32 %v988_v1, %v30_v16  ;;  %35 = vadd.xlane.f32.xlu1 %v33_v17  ;;  %v910_v16 = vld [vmem:[%s1219_s3 + $0x70] sm:$0xff]  }
  0x97   :  { %v911_v17 = vld [vmem:[%s1219_s3 + $0xf0] sm:$0xff]  }
  0x98   :  { %v34_v19 = vmul.f32 %v1028_v18, %v1028_v18 }
  0x9a   :  { %37 = vadd.xlane.f32.xlu1 %v34_v19  ;;  %v913_v19 = vld [vmem:[%s1219_s3 + $0xb0] sm:$0xff]  }
 0x123   :  { %v36_v45 = vpop.xlane.xlu1 %35 }
 0x124   :  { %v39_v46 = vmul.f32 0.0078125, %v36_v45 }
 0x126   :  { %v41_v47 = vadd.f32 1e-05, %v39_v46 }
 0x127   :  { %v38_v48 = vpop.xlane.xlu1 %37 }
 0x128   :  { %v40_v49 = vmul.f32 0.0078125, %v38_v48  ;;  %918 = vrsqrt.f32 %v41_v47 }
 0x12a   :  { %v42_v50 = vadd.f32 1e-05, %v40_v49 }
 0x12c   :  { %920 = vrsqrt.f32 %v42_v50 }
 0x132   :  { %v919_v51 = vpop.eup %918 }
 0x133   :  { %v45_v53 = vmul.f32 %v919_v51, %v1023_v14  ;;  %v908_v14 = vld [vmem:[%s1219_s3 + $0x28] sm:$0xff]  }
 0x136   :  { %v921_v52 = vpop.eup %920 }
 0x137   :  { %v46_v54 = vmul.f32 %v921_v52, %v1028_v18  ;;  %v912_v18 = vld [vmem:[%s1219_s3 + $0x30] sm:$0xff]  }
 0x139   :  { %v47_v57 = vpack.c.bf16 %v46_v54, %v45_v53 }
 0x13b   :  { %295 = vmatmul.mubr.bf16.vlgmr.msra.gmra.mrb[0].mxu0 %v47_v57  ;;  %338 = vmatmul.mubr.bf16.vlgmr.msra.gmra.mrb[0].mxu1 %v47_v57 }
 0x13c   :  { %791 = vmatpush3.bf16.msra.mxu0 %v888_v55  ;;  %813 = vmatpush3.bf16.msra.mxu1 %v889_v56 }
 0x13d   :  { %792 = vmatprep.subr.bf16.mxu0 %v890_v58  ;;  %814 = vmatprep.subr.bf16.mxu1 %v891_v59 }
 0x140   :  { %793 = vmatpush3.bf16.msra.mxu0 %v892_v60  ;;  %815 = vmatpush3.bf16.msra.mxu1 %v893_v61 }
 0x141   :  { %794 = vmatprep.subr.bf16.mxu0 %v894_v62  ;;  %816 = vmatprep.subr.bf16.mxu1 %v895_v63 }
 0x144   :  { %795 = vmatpush3.bf16.msra.mxu0 %v896_v2  ;;  %817 = vmatpush3.bf16.msra.mxu1 %v897_v3  ;;  %v757_v3 = vld [vmem:[%s1220_s4] ss:$0 sm:$0xff]  ;;  %s922_s4 = scalar_lea.vmem %s715_s20, 256 }
 0x145   :  { %796 = vmatprep.subr.bf16.mxu0 %v898_v4  ;;  %818 = vmatprep.subr.bf16.mxu1 %v899_v5  ;;  %p923_p0 = scmp.ne.s32.totalorder %s715_s20, %s922_s4  ;;  %p928_p2 = scmp.lt.s32.totalorder %s922_s4, %s922_s4 }
 0x147   :  { %p929_p3 = por %p928_p2, %p927_p1 }
 0x148   :  { %797 = vmatpush3.bf16.msra.mxu0 %v900_v6  ;;  %819 = vmatpush3.bf16.msra.mxu1 %v901_v7 }
 0x149   :  { %798 = vmatprep.subr.bf16.mxu0 %v902_v8  ;;  %820 = vmatprep.subr.bf16.mxu1 %v903_v9  ;;  %p930_p4 = pnand %p929_p3, %p923_p0 }
 0x14c   :  { %799 = vmatpush3.bf16.msra.mxu0 %v904_v10  ;;  %821 = vmatpush3.bf16.msra.mxu1 %v905_v11 }
 0x14d   :  { %800 = vmatprep.subr.bf16.mxu0 %v906_v12  ;;  %822 = vmatprep.subr.bf16.mxu1 %v907_v13 }
 0x150   :  { %801 = vmatpush3.bf16.msra.mxu0 %v908_v14  ;;  %823 = vmatpush3.bf16.msra.mxu1 %v909_v15 }
 0x151   :  { %802 = vmatprep.subr.bf16.mxu0 %v910_v16  ;;  %824 = vmatprep.subr.bf16.mxu1 %v911_v17 }
 0x154   :  { %803 = vmatpush3.bf16.msra.mxu0 %v912_v18  ;;  %825 = vmatpush3.bf16.msra.mxu1 %v913_v19 }
 0x155   :  { %804 = vmatprep.subr.bf16.mxu0 %v914_v20  ;;  %826 = vmatprep.subr.bf16.mxu1 %v915_v21 }
 0x158   :  { %805 = vmatpush3.bf16.msra.mxu0 %v916_v22  ;;  %827 = vmatpush3.bf16.msra.mxu1 %v917_v23 }
 0x20e   :  { %v296_v35 = vpop.f32.mrb[0].mxu0  ;;  %v339_v36 = vpop.f32.mrb[0].mxu1 }
 0x20f   :  { %v297_v37 = vadd.f32 %v296_v35, %v85_v31  ;;  %v340_v38 = vadd.f32 %v339_v36, %v93_v32  ;;  %v298_v39 = vpop.f32.mrb[1].mxu0  ;;  %v341_v40 = vpop.f32.mrb[1].mxu1 }
 0x210   :  { %v299_v41 = vadd.f32 %v298_v39, %v89_v33  ;;  %v342_v42 = vadd.f32 %v341_v40, %v97_v34  ;;  %v300_v43 = vpop.f32.mrb[2].mxu0  ;;  %v343_v44 = vpop.f32.mrb[2].mxu1 }
 0x211   :  { %v301_v45 = vadd.f32 %v300_v43, %v85_v31  ;;  %v344_v46 = vadd.f32 %v343_v44, %v93_v32  ;;  %v302_v47 = vpop.f32.mrb[3].mxu0  ;;  %v345_v48 = vpop.f32.mrb[3].mxu1  ;;  %v348_v51 = vmax.f32 %v297_v37, 0.0  ;;  %v350_v52 = vmax.f32 %v340_v38, 0.0 }
 0x212   :  { %v303_v49 = vadd.f32 %v302_v47, %v89_v33  ;;  %v346_v50 = vadd.f32 %v345_v48, %v97_v34  ;;  %v349_v55 = vmax.f32 %v299_v41, 0.0  ;;  %v351_v56 = vmax.f32 %v342_v42, 0.0 }
 0x213   :  { %v352_v53 = vmax.f32 %v301_v45, 0.0  ;;  %v354_v54 = vmax.f32 %v344_v46, 0.0 }
 0x214   :  { %v353_v57 = vmax.f32 %v303_v49, 0.0  ;;  %v355_v58 = vmax.f32 %v346_v50, 0.0 }
 0x215   :  { %v356_v59 = vpack.c.bf16 %v352_v53, %v348_v51  ;;  %v358_v60 = vpack.c.bf16 %v354_v54, %v350_v52 }
 0x216   :  { %v357_v61 = vpack.c.bf16 %v353_v57, %v349_v55  ;;  %v359_v62 = vpack.c.bf16 %v355_v58, %v351_v56 }
 0x218   :  { %655 = vmatprep.mubr.bf16.mxu0 %v357_v61  ;;  %696 = vmatprep.mubr.bf16.mxu1 %v359_v62 }
 0x219   :  { %656 = vmatmul.mubr.bf16.vlgmr.msra.gmra.mrb[4].mxu0 %v356_v59  ;;  %697 = vmatmul.mubr.bf16.vlgmr.msra.gmra.mrb[4].mxu1 %v358_v60 }
 0x2ec   :  { %v806_v63 = vpop.f32.mrb[4].mxu0  ;;  %v828_v2 = vpop.f32.mrb[4].mxu1 }
 0x2ed   :  { %v807_v4 = vpop.f32.mrb[5].mxu0  ;;  %v829_v5 = vpop.f32.mrb[5].mxu1 }
 0x2ee   :  { %v808_v6 = vadd.f32 %v807_v4, %v806_v63  ;;  %v830_v7 = vadd.f32 %v829_v5, %v828_v2  ;;  %v809_v8 = vpop.f32.mrb[6].mxu0  ;;  %v831_v9 = vpop.f32.mrb[6].mxu1 }
 0x2ef   :  { %v810_v10 = vpop.f32.mrb[7].mxu0  ;;  %v832_v11 = vpop.f32.mrb[7].mxu1 }
 0x2f0   :  { %v658_v12 = vadd.f32 %v808_v6, %v757_v3  ;;  %v811_v13 = vadd.f32 %v810_v10, %v809_v8  ;;  %v833_v14 = vadd.f32 %v832_v11, %v831_v9 }
 0x2f2   :  { %v699_v15 = vadd.f32 %v830_v7, %v658_v12  ;;  %v661_v16 = vadd.f32 %v811_v13, %v757_v3 }
 0x2f4   :  { %v705_v17 = vadd.f32 %v699_v15, %v983_v0  ;;  %v702_v18 = vadd.f32 %v833_v14, %v661_v16 }
 0x2f6   :  { %707 = vst [vmem:[#allocation2] sm:$0xff] %v705_v17  ;;  %v706_v19 = vadd.f32 %v702_v18, %v988_v1 }
 0x2f8   :  { %708 = vst [vmem:[#allocation2 + $0x8] sm:$0xff] %v706_v19 }
 0x2f9   :  { %933 = shalt.err (!%p930_p4)
}
 0x2fa   :  { %s934_s23 = scalar_lea.hbm %s1221_s5, 256 }
 0x2fb   :  { %p935_p5 = scmp.ne.s32.totalorder %s1221_s5, %s934_s23  ;;  %p938_p6 = scmp.lt.u32.totalorder %s934_s23, %s1221_s5 }
 0x2fd   :  { %p940_p7 = pnand %p938_p6, %p935_p5 }
 0x2ff   :  { %943 = shalt.err (!%p940_p7)
}
 0x300   :  { %s948_s28 = smov 128   ;;  %s949_s29 = smov 8  }
 0x301   :  { %720 = dma.vmem_to_hbm [thread:$0]  %s715_s20, 256, %s1221_s5, [#allocation3], %s948_s28, %s948_s28, %s949_s29  }
 0x302   :  { %944 = dma.done.wait [#allocation3], 256  }
 0x303   :  { %945 = vsyncadd [#allocation3], 4294967040 }
 0x304   :  { %724 = vsyncpa [#allocation3], 1 }

</bundles_post_ra>
